<compile_context>
chip_gen: v6e
topology: v6e:2x2x1
jax: 0.10.0
libtpu: 0.0.40
codegen_flags: <defaults>
</compile_context>

<pallas_src>
import functools

import jax
import jax.numpy as jnp
from jax.experimental import pallas as pl
from jax.experimental.pallas import tpu as pltpu


_MIN_STEPS = 2  # >= 2 grid steps so v7x's two TensorCores both get work


def _round_up(n, m):
    return ((n + m - 1) // m) * m


def _pick_tb(batch, tb):
    """Batch-tile selection.

    - batch <= 256: one block spanning the whole batch (any size is legal when
      the block equals the full array dim).
    - otherwise: a multiple of 256 (MXU depth on v6e/v7x; also fine on v5e),
      sized so the grid has at least _MIN_STEPS steps, capped at min(tb, 4096)
      to stay inside v7x's smaller VMEM without touching vmem_limit_bytes.
    """
    if batch <= 256:
        return batch
    tb = min(max(tb, 256), 4096)
    tb_split = _round_up(pl.cdiv(batch, _MIN_STEPS), 256)
    return max(256, min(tb, tb_split))


def _mlp_kernel(x_ref, w1_ref, b1_ref, w2_ref, b2_ref, w3_ref, b3_ref, o_ref):
    # fc1 + ReLU (f32 accumulation regardless of operand dtype).
    h1 = jnp.dot(x_ref[...], w1_ref[...], preferred_element_type=jnp.float32)
    h1 = jnp.maximum(h1 + b1_ref[...], 0.0)
    # fc2 + ReLU. Cast the activation to the weight dtype: no-op in f32 mode,
    # keeps the bf16 fast path fully on the bf16-native MXU.
    h2 = jnp.dot(h1.astype(w2_ref.dtype), w2_ref[...],
                 preferred_element_type=jnp.float32)
    h2 = jnp.maximum(h2 + b2_ref[...], 0.0)
    # fc3 (no activation).
    h3 = jnp.dot(h2.astype(w3_ref.dtype), w3_ref[...],
                 preferred_element_type=jnp.float32)
    o_ref[...] = (h3 + b3_ref[...]).astype(o_ref.dtype)


@functools.partial(jax.jit, static_argnames=("d_out", "tb", "use_bf16"))
def linear_classifier2(x, w1, b1, w2, b2, w3, b3, *, d_out=None, tb=2048,
                       use_bf16=False):
    """y = fc3(relu(fc2(relu(fc1(x))))) in one fused Pallas call, tiled over B.

    Pre-pad w3/b3 once with pad_fc3() so no per-call padding copy is needed.
    d_out=90 slices the true output columns; d_out=None returns the
    lane-padded [B, 128] buffer directly (no extra output copy).
    """
    B, d_in = x.shape
    h1_dim = w1.shape[1]
    h2_dim = w2.shape[1]
    d_out_w = w3.shape[1]
    if d_out is None:
        d_out = d_out_w

    # Fallback lane-pad (prefer the one-time pad_fc3() at init).
    d_out_p = _round_up(max(d_out_w, 128), 128)
    if d_out_p != d_out_w:
        w3 = jnp.pad(w3, ((0, 0), (0, d_out_p - d_out_w)))
        b3 = jnp.pad(b3, ((0, 0), (0, d_out_p - d_out_w)))

    if use_bf16:
        # bf16 operands, f32 accumulation (v6e/v7x MXU-native). ~1e-2 accuracy:
        # only use when the 1e-4 tolerance contract is relaxed.
        x = x.astype(jnp.bfloat16)
        w1, w2, w3 = (w1.astype(jnp.bfloat16), w2.astype(jnp.bfloat16),
                      w3.astype(jnp.bfloat16))

    TB = _pick_tb(B, tb)
    grid = (pl.cdiv(B, TB),)  # ragged last block handled by Pallas masking

    # Weights/biases: full block, same block index every grid step -> resident.
    resident = lambda a: pl.BlockSpec(a.shape, lambda i: (0,) * a.ndim)

    itemsize = jnp.dtype(x.dtype).itemsize
    flops = 2 * B * (d_in * h1_dim + h1_dim * h2_dim + h2_dim * d_out_p)
    bytes_accessed = (
        itemsize * (B * d_in + d_in * h1_dim + h1_dim * h2_dim + h2_dim * d_out_p)
        + 4 * (h1_dim + h2_dim + d_out_p + B * d_out_p)
    )

    out = pl.pallas_call(
        _mlp_kernel,
        out_shape=jax.ShapeDtypeStruct((B, d_out_p), jnp.float32),
        grid=grid,
        in_specs=[
            pl.BlockSpec((TB, d_in), lambda i: (i, 0)),  # x streamed over batch
            resident(w1), resident(b1),
            resident(w2), resident(b2),
            resident(w3), resident(b3),
        ],
        out_specs=pl.BlockSpec((TB, d_out_p), lambda i: (i, 0)),
        compiler_params=pltpu.CompilerParams(
            # Batch tiles are independent -> shard across both TCs on v7x.
            dimension_semantics=("parallel",),
        ),
        cost_estimate=pl.CostEstimate(
            flops=flops, transcendentals=0, bytes_accessed=bytes_accessed
        ),
    )(x, w1, b1, w2, b2, w3, b3)

    if d_out != d_out_p:
        out = out[:, :d_out]  # small copy; skip entirely by passing d_out=None
    return out


def pad_fc3(w3, b3, lane=128):
    """One-time lane-pad of the final layer (hoisted out of the per-call path)."""
    d_out = w3.shape[1]
    d_out_p = _round_up(max(d_out, lane), lane)
    if d_out_p == d_out:
        return w3, b3
    pad = d_out_p - d_out
    return jnp.pad(w3, ((0, 0), (0, pad))), jnp.pad(b3, ((0, 0), (0, pad)))


def init_params(key, input_dim=24, output_dim=90, n_hidden=256):
    """Deterministic init mimicking torch.nn.Linear default:
    U(-1/sqrt(fan_in), 1/sqrt(fan_in)) for both weight and bias."""
    ks = jax.random.split(key, 6)

    def linear(kw, kb, fan_in, fan_out):
        bound = 1.0 / jnp.sqrt(jnp.float32(fan_in))
        # stored as [fan_in, fan_out] (transpose of torch's [out, in])
        w = jax.random.uniform(kw, (fan_in, fan_out), jnp.float32, -bound, bound)
        b = jax.random.uniform(kb, (1, fan_out), jnp.float32, -bound, bound)
        return w, b

    w1, b1 = linear(ks[0], ks[1], input_dim, n_hidden)
    w2, b2 = linear(ks[2], ks[3], n_hidden, n_hidden)
    w3, b3 = linear(ks[4], ks[5], n_hidden, output_dim)
    return w1, b1, w2, b2, w3, b3


def reference(x, w1, b1, w2, b2, w3, b3):
    h = jnp.maximum(x @ w1 + b1, 0.0)
    h = jnp.maximum(h @ w2 + b2, 0.0)
    return h @ w3 + b3


if __name__ == "__main__":
    key = jax.random.PRNGKey(0)
    k_x, k_x2, k_p = jax.random.split(key, 3)

    input_dim, output_dim, n_hidden = 24, 90, 256
    w1, b1, w2, b2, w3, b3 = init_params(k_p, input_dim, output_dim, n_hidden)
    # Hoisted one-time lane-pad of fc3 (90 -> 128), outside the per-call path.
    w3p, b3p = pad_fc3(w3, b3)

    # Small batch: single full-batch block.
    B = 8
    x = jax.random.normal(k_x, (B, input_dim), jnp.float32)
    out = jax.block_until_ready(
        linear_classifier2(x, w1, b1, w2, b2, w3p, b3p, d_out=output_dim))
    ref = reference(x, w1, b1, w2, b2, w3, b3)
    assert out.shape == (B, output_dim), out.shape
    assert jnp.allclose(out, ref, atol=1e-4, rtol=1e-4), "mismatch vs reference (B=8)"

    # Medium batch: 2-step grid (both v7x TCs get work) + ragged last block.
    B2 = 300
    x2 = jax.random.normal(k_x2, (B2, input_dim), jnp.float32)
    out2 = jax.block_until_ready(
        linear_classifier2(x2, w1, b1, w2, b2, w3p, b3p, d_out=output_dim))
    ref2 = reference(x2, w1, b1, w2, b2, w3, b3)
    assert out2.shape == (B2, output_dim), out2.shape
    assert jnp.allclose(out2, ref2, atol=1e-4, rtol=1e-4), "mismatch vs reference (B=300)"

    # Optional bf16 fast path (v6e/v7x bf16-native MXU); looser tolerance by design.
    out_bf = jax.block_until_ready(
        linear_classifier2(x2, w1, b1, w2, b2, w3p, b3p, d_out=output_dim,
                           use_bf16=True))
    assert out_bf.shape == (B2, output_dim), out_bf.shape
    assert jnp.allclose(out_bf, ref2, atol=5e-2, rtol=5e-2), "bf16 path diverged"

    print("KERNEL_OK")
</pallas_src>

<mosaic_0001>
module attributes {stable_mosaic.version = 11 : i64} {
  func.func @_mlp_kernel(%arg0: i32, %arg1: memref<8x24xf32, #tpu.memory_space<vmem>>, %arg2: memref<24x256xf32, #tpu.memory_space<vmem>>, %arg3: memref<1x256xf32, #tpu.memory_space<vmem>>, %arg4: memref<256x256xf32, #tpu.memory_space<vmem>>, %arg5: memref<1x256xf32, #tpu.memory_space<vmem>>, %arg6: memref<256x128xf32, #tpu.memory_space<vmem>>, %arg7: memref<1x128xf32, #tpu.memory_space<vmem>>, %arg8: memref<8x128xf32, #tpu.memory_space<vmem>>) attributes {dimension_semantics = [#tpu.dimension_semantics<parallel>], iteration_bounds = array<i64: 1>, scalar_prefetch = 0 : i64, scratch_operands = 0 : i64, tpu.core_type = #tpu.core_type<tc>, window_params = [{transform_indices = @transform_0, window_bounds = array<i64: 8, 24>}, {pipeline_mode = #tpu.pipeline_mode<synchronous>, transform_indices = @transform_1, window_bounds = array<i64: 24, 256>}, {pipeline_mode = #tpu.pipeline_mode<synchronous>, transform_indices = @transform_2, window_bounds = array<i64: 1, 256>}, {pipeline_mode = #tpu.pipeline_mode<synchronous>, transform_indices = @transform_3, window_bounds = array<i64: 256, 256>}, {pipeline_mode = #tpu.pipeline_mode<synchronous>, transform_indices = @transform_4, window_bounds = array<i64: 1, 256>}, {pipeline_mode = #tpu.pipeline_mode<synchronous>, transform_indices = @transform_5, window_bounds = array<i64: 256, 128>}, {pipeline_mode = #tpu.pipeline_mode<synchronous>, transform_indices = @transform_6, window_bounds = array<i64: 1, 128>}, {transform_indices = @transform_7, window_bounds = array<i64: 8, 128>}]} {
    %c0 = arith.constant 0 : index
    %c0_0 = arith.constant 0 : index
    %0 = vector.load %arg1[%c0, %c0_0] : memref<8x24xf32, #tpu.memory_space<vmem>>, vector<8x24xf32>
    %c0_1 = arith.constant 0 : index
    %c0_2 = arith.constant 0 : index
    %1 = vector.load %arg2[%c0_1, %c0_2] : memref<24x256xf32, #tpu.memory_space<vmem>>, vector<24x256xf32>
    %cst = arith.constant dense<0.000000e+00> : vector<8x256xf32>
    %2 = tpu.matmul %0, %1, %cst {dimension_numbers = #tpu.dot_dimension_numbers<[1], [0], [0], [1], [0, 0, 1, 1], [], []>} : vector<8x24xf32>, vector<24x256xf32>, vector<8x256xf32> -> vector<8x256xf32>
    %c0_3 = arith.constant 0 : index
    %c0_4 = arith.constant 0 : index
    %3 = vector.load %arg3[%c0_3, %c0_4] : memref<1x256xf32, #tpu.memory_space<vmem>>, vector<1x256xf32>
    %4 = vector.broadcast %3 : vector<1x256xf32> to vector<8x256xf32>
    %5 = arith.addf %2, %4 : vector<8x256xf32>
    %cst_5 = arith.constant 0.000000e+00 : f32
    %6 = vector.broadcast %cst_5 : f32 to vector<8x256xf32>
    %7 = arith.maximumf %5, %6 : vector<8x256xf32>
    %c0_6 = arith.constant 0 : index
    %c0_7 = arith.constant 0 : index
    %8 = vector.load %arg4[%c0_6, %c0_7] : memref<256x256xf32, #tpu.memory_space<vmem>>, vector<256x256xf32>
    %cst_8 = arith.constant dense<0.000000e+00> : vector<8x256xf32>
    %9 = tpu.matmul %7, %8, %cst_8 {dimension_numbers = #tpu.dot_dimension_numbers<[1], [0], [0], [1], [0, 0, 1, 1], [], []>} : vector<8x256xf32>, vector<256x256xf32>, vector<8x256xf32> -> vector<8x256xf32>
    %c0_9 = arith.constant 0 : index
    %c0_10 = arith.constant 0 : index
    %10 = vector.load %arg5[%c0_9, %c0_10] : memref<1x256xf32, #tpu.memory_space<vmem>>, vector<1x256xf32>
    %11 = vector.broadcast %10 : vector<1x256xf32> to vector<8x256xf32>
    %12 = arith.addf %9, %11 : vector<8x256xf32>
    %cst_11 = arith.constant 0.000000e+00 : f32
    %13 = vector.broadcast %cst_11 : f32 to vector<8x256xf32>
    %14 = arith.maximumf %12, %13 : vector<8x256xf32>
    %c0_12 = arith.constant 0 : index
    %c0_13 = arith.constant 0 : index
    %15 = vector.load %arg6[%c0_12, %c0_13] : memref<256x128xf32, #tpu.memory_space<vmem>>, vector<256x128xf32>
    %cst_14 = arith.constant dense<0.000000e+00> : vector<8x128xf32>
    %16 = tpu.matmul %14, %15, %cst_14 {dimension_numbers = #tpu.dot_dimension_numbers<[1], [0], [0], [1], [0, 0, 1, 1], [], []>} : vector<8x256xf32>, vector<256x128xf32>, vector<8x128xf32> -> vector<8x128xf32>
    %c0_15 = arith.constant 0 : index
    %c0_16 = arith.constant 0 : index
    %17 = vector.load %arg7[%c0_15, %c0_16] : memref<1x128xf32, #tpu.memory_space<vmem>>, vector<1x128xf32>
    %18 = vector.broadcast %17 : vector<1x128xf32> to vector<8x128xf32>
    %19 = arith.addf %16, %18 : vector<8x128xf32>
    %c0_17 = arith.constant 0 : index
    %c0_18 = arith.constant 0 : index
    %20 = vector.load %arg8[%c0_17, %c0_18] : memref<8x128xf32, #tpu.memory_space<vmem>>, vector<8x128xf32>
    tpu.vector_store %arg8[%c0_17, %c0_18], %19 {strides = array<i32>} : memref<8x128xf32, #tpu.memory_space<vmem>>, vector<8x128xf32>,
    return
  }
  func.func @transform_0(%arg0: i32) -> (i32, i32) {
    %c0_i32 = arith.constant 0 : i32
    %c0_i32_0 = arith.constant 0 : i32
    return %arg0, %c0_i32 : i32, i32
  }
  func.func @transform_1(%arg0: i32) -> (i32, i32) {
    %c0_i32 = arith.constant 0 : i32
    %c0_i32_0 = arith.constant 0 : i32
    %c0_i32_1 = arith.constant 0 : i32
    return %c0_i32, %c0_i32_0 : i32, i32
  }
  func.func @transform_2(%arg0: i32) -> (i32, i32) {
    %c0_i32 = arith.constant 0 : i32
    %c0_i32_0 = arith.constant 0 : i32
    %c0_i32_1 = arith.constant 0 : i32
    return %c0_i32, %c0_i32_0 : i32, i32
  }
  func.func @transform_3(%arg0: i32) -> (i32, i32) {
    %c0_i32 = arith.constant 0 : i32
    %c0_i32_0 = arith.constant 0 : i32
    %c0_i32_1 = arith.constant 0 : i32
    return %c0_i32, %c0_i32_0 : i32, i32
  }
  func.func @transform_4(%arg0: i32) -> (i32, i32) {
    %c0_i32 = arith.constant 0 : i32
    %c0_i32_0 = arith.constant 0 : i32
    %c0_i32_1 = arith.constant 0 : i32
    return %c0_i32, %c0_i32_0 : i32, i32
  }
  func.func @transform_5(%arg0: i32) -> (i32, i32) {
    %c0_i32 = arith.constant 0 : i32
    %c0_i32_0 = arith.constant 0 : i32
    %c0_i32_1 = arith.constant 0 : i32
    return %c0_i32, %c0_i32_0 : i32, i32
  }
  func.func @transform_6(%arg0: i32) -> (i32, i32) {
    %c0_i32 = arith.constant 0 : i32
    %c0_i32_0 = arith.constant 0 : i32
    %c0_i32_1 = arith.constant 0 : i32
    return %c0_i32, %c0_i32_0 : i32, i32
  }
  func.func @transform_7(%arg0: i32) -> (i32, i32) {
    %c0_i32 = arith.constant 0 : i32
    %c0_i32_0 = arith.constant 0 : i32
    return %arg0, %c0_i32 : i32, i32
  }
}

</mosaic_0001>

<bundles_post_ra>
// kernel: linear_classifier2.1
= control target key start
LH: loop header
LB: loop body
LE: loop exit
PB: predicated region body
PF: predicated region fallthrough
CT: control target
= control target key end

     0   :  { %12 = vsyncpa [#allocation3], 0  ;;  %s681_s0 = inlined_call_operand.hbm [shape: f32[8,24], index: 0, kind: input, shape index: {}]   ;;  %s682_s1 = inlined_call_operand.hbm [shape: f32[24,256], index: 1, kind: input, shape index: {}]   ;;  %s683_s2 = inlined_call_operand.vmem [shape: f32[1,256], index: 2, kind: input, shape index: {}]   ;;  %s684_s3 = inlined_call_operand.hbm [shape: f32[256,256], index: 3, kind: input, shape index: {}]   ;;  %s685_s4 = inlined_call_operand.vmem [shape: f32[1,256], index: 4, kind: input, shape index: {}]   ;;  %s686_s5 = inlined_call_operand.hbm [shape: f32[256,128], index: 5, kind: input, shape index: {}]   ;;  %s687_s6 = inlined_call_operand.vmem [shape: f32[1,128], index: 6, kind: input, shape index: {}]   ;;  %s688_s7 = inlined_call_operand.hbm [shape: f32[8,128], index: 7, kind: output, shape index: {}]  }
   0x1   :  { %13 = vsyncpa [#allocation6], 0 }
   0x2   :  { %14 = vsyncpa [#allocation9], 0 }
   0x3   :  { %15 = vsyncpa [#allocation4], 0  ;;  %s607_s24 = smov [#allocation5]  }
   0x4   :  { %s31_s25 = sshll.u32 %s607_s24, 4  ;;  %s32_s25 = int_to_ptr.vmem [resolvable:$true] %s31_s25 }
   0x5   :  { %s507_s26 = scalar_lea.vmem %s32_s25, 768  ;;  %p512_p1 = scmp.lt.s32.totalorder %s32_s25, %s32_s25 }
   0x6   :  { %p508_p0 = scmp.ne.s32.totalorder %s32_s25, %s507_s26  ;;  %p513_p2 = scmp.lt.s32.totalorder %s507_s26, %s507_s26 }
   0x8   :  { %p514_p3 = por %p513_p2, %p512_p1 }
   0xa   :  { %p515_p4 = pnand %p514_p3, %p508_p0 }
   0xc   :  { %518 = shalt.err (!%p515_p4)
}
   0xd   :  { %s608_s27 = smov 256   ;;  %s609_s28 = smov 16  }
   0xe   :  { %37 = dma.hbm_to_vmem [thread:$0]  %s682_s1, 768, %s32_s25, [#allocation6], %s608_s27, %s608_s27, %s609_s28  }
   0xf   :  { %s610_s8 = smov [#allocation2]   ;;  %s611_s10 = smov [#allocation7]  }
  0x10   :  { %s22_s9 = sshll.u32 %s610_s8, 4  ;;  %s45_s11 = sshll.u32 %s611_s10, 4  ;;  %s23_s9 = int_to_ptr.vmem [resolvable:$true] %s22_s9  ;;  %s46_s11 = int_to_ptr.vmem [resolvable:$true] %s45_s11 }
  0x11   :  { %s527_s12 = scalar_lea.vmem %s23_s9, 128  ;;  %p532_p6 = scmp.lt.s32.totalorder %s23_s9, %s23_s9 }
  0x12   :  { %p528_p5 = scmp.ne.s32.totalorder %s23_s9, %s527_s12  ;;  %p533_p7 = scmp.lt.s32.totalorder %s527_s12, %s527_s12 }
  0x14   :  { %p534_p8 = por %p533_p7, %p532_p6 }
  0x16   :  { %p535_p9 = pnand %p534_p8, %p528_p5 }
  0x18   :  { %538 = shalt.err (!%p535_p9)
}
  0x19   :  { %25 = dma.hbm_to_vmem [thread:$0]  %s681_s0, 128, %s23_s9, [#allocation3]  }
  0x1a   :  { %s547_s15 = scalar_lea.vmem %s46_s11, 8192  ;;  %p552_p11 = scmp.lt.s32.totalorder %s46_s11, %s46_s11 }
  0x1b   :  { %p548_p10 = scmp.ne.s32.totalorder %s46_s11, %s547_s15  ;;  %p553_p12 = scmp.lt.s32.totalorder %s547_s15, %s547_s15 }
  0x1d   :  { %p554_p13 = por %p553_p12, %p552_p11 }
  0x1f   :  { %p555_p0 = pnand %p554_p13, %p548_p10 }
  0x21   :  { %558 = shalt.err (!%p555_p0)
}
  0x22   :  { %51 = dma.hbm_to_vmem [thread:$0]  %s684_s3, 8192, %s46_s11, [#allocation6], %s608_s27, %s608_s27, %s609_s28  }
  0x23   :  { %s612_s17 = smov [#allocation8]  }
  0x24   :  { %s59_s18 = sshll.u32 %s612_s17, 4  ;;  %s60_s18 = int_to_ptr.vmem [resolvable:$true] %s59_s18 }
  0x25   :  { %s567_s19 = scalar_lea.vmem %s60_s18, 4096  ;;  %p572_p2 = scmp.lt.s32.totalorder %s60_s18, %s60_s18 }
  0x26   :  { %p568_p1 = scmp.ne.s32.totalorder %s60_s18, %s567_s19  ;;  %p573_p3 = scmp.lt.s32.totalorder %s567_s19, %s567_s19 }
  0x28   :  { %p574_p4 = por %p573_p3, %p572_p2 }
  0x2a   :  { %p575_p5 = pnand %p574_p4, %p568_p1 }
  0x2c   :  { %578 = shalt.err (!%p575_p5)
}
  0x2d   :  { %s613_s0 = smov 128   ;;  %s614_s20 = smov 8  }
  0x2e   :  { %65 = dma.hbm_to_vmem [thread:$0]  %s686_s5, 4096, %s60_s18, [#allocation9], %s613_s0, %s613_s0, %s614_s20  }
  0x2f   :  { %599 = dma.done.wait [#allocation3], 128  }
  0x30   :  { %600 = vsyncadd [#allocation3], 4294967168 }
  0x31   :  { %601 = dma.done.wait [#allocation6], 8960  }
  0x32   :  { %602 = vsyncadd [#allocation6], 4294958336 }
  0x33   :  { %603 = dma.done.wait [#allocation9], 4096  }
  0x34   :  { %604 = vsyncadd [#allocation9], 4294963200  ;;  %v615_v0 = vmov 0.0   ;;  %v86_v1 = vld [vmem:[#allocation5 + $0x28] sm:$0xff]  ;;  %v85_v2 = vld [vmem:[#allocation5 + $0x20] sm:$0xff]  ;;  %vm99_vm0 = vcmask 195584  }
  0x35   :  { %167 = vmatprep.mubr.f32.mxu0 %v615_v0  ;;  %v84_v3 = vld [vmem:[#allocation5 + $0x18] sm:$0xff]  ;;  %129 = vmatprep.subr.mxu0 %v86_v1  ;;  %v83_v4 = vld [vmem:[#allocation5 + $0x10] sm:$0xff]  ;;  %v82_v5 = vld [vmem:[#allocation5 + $0x8] sm:$0xff]  ;;  %s616_s26 = smov [#allocation10]  }
  0x36   :  { %130 = vmatpush1.msra.mxu0 %v85_v2  ;;  %v207_v6 = vld [vmem:[#allocation7 + $0xf8] sm:$0xff]  ;;  %v206_v7 = vld [vmem:[#allocation7 + $0xf0] sm:$0xff]  ;;  %v205_v9 = vld [vmem:[#allocation7 + $0xe8] sm:$0xff]  ;;  %s441_s27 = sshll.u32 %s616_s26, 4  ;;  %s442_s27 = int_to_ptr.vmem [resolvable:$true] %s441_s27 }
  0x37   :  { %131 = vmatprep.subr.mxu0 %v84_v3  ;;  %v81_v8 = vld [vmem:[#allocation5] sm:$0xff]  ;;  %252 = vmatprep.subr.mxu1 %v207_v6  ;;  %v204_v10 = vld [vmem:[#allocation7 + $0xe0] sm:$0xff]  ;;  %v80_v11 = vld [vmem:[#allocation2] sm:$0xff]  ;;  %p584_p7 = scmp.lt.s32.totalorder %s442_s27, %s442_s27 }
  0x38   :  { %132 = vmatpush1.msra.mxu0 %v83_v4  ;;  %253 = vmatpush1.msra.mxu1 %v206_v7  ;;  %v203_v12 = vld [vmem:[#allocation7 + $0xd8] sm:$0xff]  ;;  %v202_v13 = vld [vmem:[#allocation7 + $0xd0] sm:$0xff]  ;;  %v201_v14 = vld [vmem:[#allocation7 + $0xc8] sm:$0xff] }
  0x39   :  { %133 = vmatprep.subr.mxu0 %v82_v5  ;;  %254 = vmatprep.subr.mxu1 %v205_v9  ;;  %v200_v15 = vld [vmem:[#allocation7 + $0xc0] sm:$0xff]  ;;  %v199_v16 = vld [vmem:[#allocation7 + $0xb8] sm:$0xff]  ;;  %v198_v17 = vld [vmem:[#allocation7 + $0xb0] sm:$0xff] }
  0x3a   :  { %134 = vmatpush1.msra.mxu0 %v81_v8  ;;  %255 = vmatpush1.msra.mxu1 %v204_v10  ;;  %v197_v18 = vld [vmem:[#allocation7 + $0xa8] sm:$0xff]  ;;  %v196_v19 = vld [vmem:[#allocation7 + $0xa0] sm:$0xff]  ;;  %v195_v20 = vld [vmem:[#allocation7 + $0x98] sm:$0xff] }
  0x3b   :  { %452 = vmatmul.mubr.msk.f32.vlgmr.msra.gmra.mxu0 %vm99_vm0, %v80_v11  ;;  %256 = vmatprep.subr.mxu1 %v203_v12  ;;  %v194_v21 = vld [vmem:[#allocation7 + $0x90] sm:$0xff]  ;;  %v193_v22 = vld [vmem:[#allocation7 + $0x88] sm:$0xff]  ;;  %v192_v23 = vld [vmem:[#allocation7 + $0x80] sm:$0xff] }
  0x3c   :  { %257 = vmatpush1.msra.mxu1 %v202_v13  ;;  %v191_v24 = vld [vmem:[#allocation7 + $0x78] sm:$0xff]  ;;  %v190_v25 = vld [vmem:[#allocation7 + $0x70] sm:$0xff]  ;;  %v189_v26 = vld [vmem:[#allocation7 + $0x68] sm:$0xff] }
  0x3d   :  { %258 = vmatprep.subr.mxu1 %v201_v14  ;;  %v188_v27 = vld [vmem:[#allocation7 + $0x60] sm:$0xff]  ;;  %v187_v28 = vld [vmem:[#allocation7 + $0x58] sm:$0xff]  ;;  %v186_v29 = vld [vmem:[#allocation7 + $0x50] sm:$0xff] }
  0x3e   :  { %259 = vmatpush1.msra.mxu1 %v200_v15  ;;  %v185_v30 = vld [vmem:[#allocation7 + $0x48] sm:$0xff]  ;;  %v184_v31 = vld [vmem:[#allocation7 + $0x40] sm:$0xff]  ;;  %v183_v32 = vld [vmem:[#allocation7 + $0x38] sm:$0xff] }
  0x3f   :  { %260 = vmatprep.subr.mxu1 %v199_v16  ;;  %v182_v33 = vld [vmem:[#allocation7 + $0x30] sm:$0xff]  ;;  %v181_v34 = vld [vmem:[#allocation7 + $0x28] sm:$0xff]  ;;  %v180_v35 = vld [vmem:[#allocation7 + $0x20] sm:$0xff] }
  0x40   :  { %261 = vmatpush1.msra.mxu1 %v198_v17  ;;  %v179_v36 = vld [vmem:[#allocation7 + $0x18] sm:$0xff]  ;;  %v178_v37 = vld [vmem:[#allocation7 + $0x10] sm:$0xff]  ;;  %v177_v38 = vld [vmem:[#allocation7 + $0x8] sm:$0xff] }
  0x41   :  { %262 = vmatprep.subr.mxu1 %v197_v18  ;;  %v176_v39 = vld [vmem:[#allocation7] sm:$0xff]  ;;  %v239_v40 = vld [vmem:[#allocation7 + $0x1f8] sm:$0xff]  ;;  %v238_v41 = vld [vmem:[#allocation7 + $0x1f0] sm:$0xff] }
  0x42   :  { %263 = vmatpush1.msra.mxu1 %v196_v19  ;;  %v237_v42 = vld [vmem:[#allocation7 + $0x1e8] sm:$0xff]  ;;  %v236_v43 = vld [vmem:[#allocation7 + $0x1e0] sm:$0xff]  ;;  %v235_v44 = vld [vmem:[#allocation7 + $0x1d8] sm:$0xff] }
  0x43   :  { %264 = vmatprep.subr.mxu1 %v195_v20  ;;  %v234_v45 = vld [vmem:[#allocation7 + $0x1d0] sm:$0xff]  ;;  %v233_v46 = vld [vmem:[#allocation7 + $0x1c8] sm:$0xff]  ;;  %v232_v47 = vld [vmem:[#allocation7 + $0x1c0] sm:$0xff] }
  0x44   :  { %265 = vmatpush1.msra.mxu1 %v194_v21  ;;  %v231_v48 = vld [vmem:[#allocation7 + $0x1b8] sm:$0xff]  ;;  %v230_v49 = vld [vmem:[#allocation7 + $0x1b0] sm:$0xff]  ;;  %v229_v50 = vld [vmem:[#allocation7 + $0x1a8] sm:$0xff] }
  0x45   :  { %266 = vmatprep.subr.mxu1 %v193_v22  ;;  %v228_v51 = vld [vmem:[#allocation7 + $0x1a0] sm:$0xff]  ;;  %v227_v52 = vld [vmem:[#allocation7 + $0x198] sm:$0xff]  ;;  %v226_v53 = vld [vmem:[#allocation7 + $0x190] sm:$0xff] }
  0x46   :  { %267 = vmatpush1.msra.mxu1 %v192_v23  ;;  %v225_v54 = vld [vmem:[#allocation7 + $0x188] sm:$0xff]  ;;  %v224_v55 = vld [vmem:[#allocation7 + $0x180] sm:$0xff]  ;;  %v223_v56 = vld [vmem:[#allocation7 + $0x178] sm:$0xff] }
  0x47   :  { %268 = vmatprep.subr.mxu1 %v191_v24  ;;  %v222_v57 = vld [vmem:[#allocation7 + $0x170] sm:$0xff]  ;;  %v221_v58 = vld [vmem:[#allocation7 + $0x168] sm:$0xff]  ;;  %v220_v59 = vld [vmem:[#allocation7 + $0x160] sm:$0xff] }
  0x48   :  { %269 = vmatpush1.msra.mxu1 %v190_v25  ;;  %v219_v60 = vld [vmem:[#allocation7 + $0x158] sm:$0xff]  ;;  %v218_v61 = vld [vmem:[#allocation7 + $0x150] sm:$0xff]  ;;  %v217_v62 = vld [vmem:[#allocation7 + $0x148] sm:$0xff] }
  0x49   :  { %270 = vmatprep.subr.mxu1 %v189_v26  ;;  %v216_v63 = vld [vmem:[#allocation7 + $0x140] sm:$0xff]  ;;  %v215_v0 = vld [vmem:[#allocation7 + $0x138] sm:$0xff]  ;;  %v214_v1 = vld [vmem:[#allocation7 + $0x130] sm:$0xff] }
  0x4a   :  { %271 = vmatpush1.msra.mxu1 %v188_v27  ;;  %v213_v2 = vld [vmem:[#allocation7 + $0x128] sm:$0xff]  ;;  %v212_v3 = vld [vmem:[#allocation7 + $0x120] sm:$0xff]  ;;  %v211_v4 = vld [vmem:[#allocation7 + $0x118] sm:$0xff] }
  0x4b   :  { %272 = vmatprep.subr.mxu1 %v187_v28  ;;  %v210_v5 = vld [vmem:[#allocation7 + $0x110] sm:$0xff]  ;;  %v209_v6 = vld [vmem:[#allocation7 + $0x108] sm:$0xff]  ;;  %v208_v7 = vld [vmem:[#allocation7 + $0x100] sm:$0xff] }
  0x4c   :  { %273 = vmatpush1.msra.mxu1 %v186_v29  ;;  %v356_v8 = vld [vmem:[#allocation8 + $0xf8] sm:$0xff]  ;;  %v355_v10 = vld [vmem:[#allocation8 + $0xf0] sm:$0xff]  ;;  %v354_v12 = vld [vmem:[#allocation8 + $0xe8] sm:$0xff] }
  0x4d   :  { %274 = vmatprep.subr.mxu1 %v185_v30  ;;  %v340_v9 = vld [vmem:[#allocation8 + $0x78] sm:$0xff]  ;;  %454 = vmatprep.subr.mxu0 %v356_v8  ;;  %v339_v11 = vld [vmem:[#allocation8 + $0x70] sm:$0xff]  ;;  %v338_v13 = vld [vmem:[#allocation8 + $0x68] sm:$0xff] }
  0x4e   :  { %275 = vmatpush1.msra.mxu1 %v184_v31  ;;  %455 = vmatpush3.msra.mxu0 %v340_v9  ;;  %v353_v14 = vld [vmem:[#allocation8 + $0xe0] sm:$0xff]  ;;  %v352_v16 = vld [vmem:[#allocation8 + $0xd8] sm:$0xff]  ;;  %v351_v18 = vld [vmem:[#allocation8 + $0xd0] sm:$0xff] }
  0x4f   :  { %276 = vmatprep.subr.mxu1 %v183_v32  ;;  %456 = vmatprep.subr.mxu0 %v355_v10  ;;  %v337_v15 = vld [vmem:[#allocation8 + $0x60] sm:$0xff]  ;;  %v336_v17 = vld [vmem:[#allocation8 + $0x58] sm:$0xff]  ;;  %v335_v19 = vld [vmem:[#allocation8 + $0x50] sm:$0xff]  ;;  %v89_v32 = vlaneseq }
  0x50   :  { %277 = vmatpush1.msra.mxu1 %v182_v33  ;;  %457 = vmatpush3.msra.mxu0 %v339_v11  ;;  %v350_v20 = vld [vmem:[#allocation8 + $0xc8] sm:$0xff]  ;;  %v349_v22 = vld [vmem:[#allocation8 + $0xc0] sm:$0xff]  ;;  %v348_v24 = vld [vmem:[#allocation8 + $0xb8] sm:$0xff] }
  0x51   :  { %278 = vmatprep.subr.mxu1 %v181_v34  ;;  %458 = vmatprep.subr.mxu0 %v354_v12  ;;  %v334_v21 = vld [vmem:[#allocation8 + $0x48] sm:$0xff]  ;;  %v333_v23 = vld [vmem:[#allocation8 + $0x40] sm:$0xff]  ;;  %v332_v25 = vld [vmem:[#allocation8 + $0x38] sm:$0xff]  ;;  %v90_v33 = vshrl.u32 %v89_v32, 7 }
  0x52   :  { %279 = vmatpush1.msra.mxu1 %v180_v35  ;;  %459 = vmatpush3.msra.mxu0 %v338_v13  ;;  %v347_v26 = vld [vmem:[#allocation8 + $0xb0] sm:$0xff]  ;;  %v346_v28 = vld [vmem:[#allocation8 + $0xa8] sm:$0xff]  ;;  %v345_v30 = vld [vmem:[#allocation8 + $0xa0] sm:$0xff] }
  0x53   :  { %280 = vmatprep.subr.mxu1 %v179_v36  ;;  %460 = vmatprep.subr.mxu0 %v353_v14  ;;  %v331_v27 = vld [vmem:[#allocation8 + $0x30] sm:$0xff]  ;;  %v330_v29 = vld [vmem:[#allocation8 + $0x28] sm:$0xff]  ;;  %v329_v31 = vld [vmem:[#allocation8 + $0x20] sm:$0xff]  ;;  %v91_v34 = vsub.s32 0, %v90_v33  ;;  %v95_v36 = vsub.s32 1, %v90_v33 }
  0x54   :  { %281 = vmatpush1.msra.mxu1 %v178_v37  ;;  %461 = vmatpush3.msra.mxu0 %v337_v15  ;;  %v87_v35 = vld [vmem:[%s683_s2] sm:$0x3] }
  0x55   :  { %282 = vmatprep.subr.mxu1 %v177_v38  ;;  %462 = vmatprep.subr.mxu0 %v352_v16  ;;  %v92_v37 = vrot.slane %v87_v35, %v91_v34  ;;  %v96_v38 = vrot.slane %v87_v35, %v95_v36 }
  0x56   :  { %283 = vmatpush1.msra.mxu1 %v176_v39  ;;  %463 = vmatpush3.msra.mxu0 %v336_v17 }
  0x57   :  { %284 = vmatprep.subr.mxu1 %v239_v40  ;;  %464 = vmatprep.subr.mxu0 %v351_v18 }
  0x58   :  { %285 = vmatpush2.msra.mxu1 %v238_v41  ;;  %465 = vmatpush3.msra.mxu0 %v335_v19 }
  0x59   :  { %286 = vmatprep.subr.mxu1 %v237_v42  ;;  %466 = vmatprep.subr.mxu0 %v350_v20 }
  0x5a   :  { %287 = vmatpush2.msra.mxu1 %v236_v43  ;;  %467 = vmatpush3.msra.mxu0 %v334_v21 }
  0x5b   :  { %288 = vmatprep.subr.mxu1 %v235_v44  ;;  %468 = vmatprep.subr.mxu0 %v349_v22 }
  0x5c   :  { %289 = vmatpush2.msra.mxu1 %v234_v45  ;;  %469 = vmatpush3.msra.mxu0 %v333_v23  ;;  %v344_v45 = vld [vmem:[#allocation8 + $0x98] sm:$0xff] }
  0x5d   :  { %290 = vmatprep.subr.mxu1 %v233_v46  ;;  %470 = vmatprep.subr.mxu0 %v348_v24  ;;  %v328_v46 = vld [vmem:[#allocation8 + $0x18] sm:$0xff] }
  0x5e   :  { %291 = vmatpush2.msra.mxu1 %v232_v47  ;;  %471 = vmatpush3.msra.mxu0 %v332_v25  ;;  %v343_v47 = vld [vmem:[#allocation8 + $0x90] sm:$0xff] }
  0x5f   :  { %292 = vmatprep.subr.mxu1 %v231_v48  ;;  %472 = vmatprep.subr.mxu0 %v347_v26  ;;  %v327_v48 = vld [vmem:[#allocation8 + $0x10] sm:$0xff] }
  0x60   :  { %293 = vmatpush2.msra.mxu1 %v230_v49  ;;  %473 = vmatpush3.msra.mxu0 %v331_v27  ;;  %v342_v49 = vld [vmem:[#allocation8 + $0x88] sm:$0xff] }
  0x61   :  { %294 = vmatprep.subr.mxu1 %v229_v50  ;;  %474 = vmatprep.subr.mxu0 %v346_v28  ;;  %v326_v50 = vld [vmem:[#allocation8 + $0x8] sm:$0xff] }
  0x62   :  { %295 = vmatpush2.msra.mxu1 %v228_v51  ;;  %475 = vmatpush3.msra.mxu0 %v330_v29  ;;  %v341_v51 = vld [vmem:[#allocation8 + $0x80] sm:$0xff] }
  0x63   :  { %296 = vmatprep.subr.mxu1 %v227_v52  ;;  %476 = vmatprep.subr.mxu0 %v345_v30  ;;  %v325_v52 = vld [vmem:[#allocation8] sm:$0xff] }
  0x64   :  { %297 = vmatpush2.msra.mxu1 %v226_v53  ;;  %477 = vmatpush3.msra.mxu0 %v329_v31  ;;  %v240_v53 = vld [vmem:[%s685_s4] sm:$0x3]  ;;  %s579_s4 = scalar_lea.vmem %s442_s27, 128 }
  0x65   :  { %298 = vmatprep.subr.mxu1 %v225_v54  ;;  %478 = vmatprep.subr.mxu0 %v344_v45  ;;  %v245_v54 = vrot.slane %v240_v53, %v91_v34  ;;  %p580_p6 = scmp.ne.s32.totalorder %s442_s27, %s579_s4  ;;  %p585_p8 = scmp.lt.s32.totalorder %s579_s4, %s579_s4 }
  0x66   :  { %299 = vmatpush2.msra.mxu1 %v224_v55  ;;  %479 = vmatpush3.msra.mxu0 %v328_v46  ;;  %v249_v55 = vrot.slane %v240_v53, %v95_v36 }
  0x67   :  { %300 = vmatprep.subr.mxu1 %v223_v56  ;;  %480 = vmatprep.subr.mxu0 %v343_v47  ;;  %p586_p9 = por %p585_p8, %p584_p7 }
  0x68   :  { %301 = vmatpush2.msra.mxu1 %v222_v57  ;;  %481 = vmatpush3.msra.mxu0 %v327_v48 }
  0x69   :  { %302 = vmatprep.subr.mxu1 %v221_v58  ;;  %482 = vmatprep.subr.mxu0 %v342_v49  ;;  %p587_p10 = pnand %p586_p9, %p580_p6 }
  0x6a   :  { %303 = vmatpush2.msra.mxu1 %v220_v59  ;;  %483 = vmatpush3.msra.mxu0 %v326_v50 }
  0x6b   :  { %304 = vmatprep.subr.mxu1 %v219_v60  ;;  %484 = vmatprep.subr.mxu0 %v341_v51 }
  0x6c   :  { %305 = vmatpush2.msra.mxu1 %v218_v61  ;;  %485 = vmatpush3.msra.mxu0 %v325_v52 }
  0x6d   :  { %306 = vmatprep.subr.mxu1 %v217_v62 }
  0x6e   :  { %307 = vmatpush2.msra.mxu1 %v216_v63  ;;  %v453_v63 = vld [vmem:[%s687_s6] ss:$0 sm:$0xff] }
  0x6f   :  { %308 = vmatprep.subr.mxu1 %v215_v0 }
  0x70   :  { %309 = vmatpush2.msra.mxu1 %v214_v1 }
  0x71   :  { %310 = vmatprep.subr.mxu1 %v213_v2 }
  0x72   :  { %311 = vmatpush2.msra.mxu1 %v212_v3 }
  0x73   :  { %312 = vmatprep.subr.mxu1 %v211_v4 }
  0x74   :  { %313 = vmatpush2.msra.mxu1 %v210_v5 }
  0x75   :  { %314 = vmatprep.subr.mxu1 %v209_v6 }
  0x76   :  { %315 = vmatpush2.msra.mxu1 %v208_v7 }
  0xfb   :  { %v169_v39 = vpop.f32.mrf.mxu0 }
  0xfc   :  { %v170_v40 = vadd.f32 %v169_v39, %v92_v37 }
  0xfd   :  { %v171_v41 = vpop.f32.mrf.mxu0 }
  0xfe   :  { %v172_v42 = vadd.f32 %v171_v41, %v96_v38  ;;  %v174_v44 = vmax.f32 %v170_v40, 0.0 }
 0x100   :  { %v175_v43 = vmax.f32 %v172_v42, 0.0 }
 0x102   :  { %316 = vmatprep.mubr.f32.mxu1 %v175_v43 }
 0x103   :  { %317 = vmatmul.mubr.f32.vlgmr.msra.gmra.mxu1 %v174_v44 }
 0x1c3   :  { %v318_v56 = vpop.f32.mrf.mxu1 }
 0x1c4   :  { %v319_v57 = vadd.f32 %v318_v56, %v245_v54 }
 0x1c5   :  { %v320_v58 = vpop.f32.mrf.mxu1 }
 0x1c6   :  { %v321_v59 = vadd.f32 %v320_v58, %v249_v55  ;;  %v323_v61 = vmax.f32 %v319_v57, 0.0 }
 0x1c8   :  { %v324_v60 = vmax.f32 %v321_v59, 0.0 }
 0x1ca   :  { %428 = vmatprep.mubr.f32.mxu0 %v324_v60 }
 0x1cb   :  { %429 = vmatmul.mubr.f32.vlgmr.msra.gmra.mxu0 %v323_v61 }
 0x28b   :  { %v486_v62 = vpop.f32.mrf.mxu0 }
 0x28d   :  { %v487_v0 = vpop.f32.mrf.mxu0 }
 0x28e   :  { %v488_v1 = vadd.f32 %v487_v0, %v486_v62 }
 0x290   :  { %v431_v2 = vadd.f32 %v488_v1, %v453_v63 }
 0x292   :  { %434 = vst [vmem:[#allocation10] sm:$0xff] %v431_v2 }
 0x293   :  { %590 = shalt.err (!%p587_p10)
}
 0x294   :  { %444 = dma.vmem_to_hbm [thread:$0]  %s442_s27, 128, %s688_s7, [#allocation4]  }
 0x295   :  { %605 = dma.done.wait [#allocation4], 128  }
 0x296   :  { %606 = vsyncadd [#allocation4], 4294967168 }
 0x297   :  { %448 = vsyncpa [#allocation3], 1 }
 0x298   :  { %449 = vsyncpa [#allocation6], 1 }
 0x299   :  { %450 = vsyncpa [#allocation9], 1 }
 0x29a   :  { %451 = vsyncpa [#allocation4], 1 }

</bundles_post_ra>
